<compile_context>
chip_gen: v5e
topology: v5e:2x2
jax: 0.10.0
libtpu: 0.0.40
codegen_flags: <defaults>
</compile_context>

<pallas_src>
import math

import jax
import jax.numpy as jnp
from jax.experimental import pallas as pl
from jax.experimental.pallas import tpu as pltpu

_BF16 = jnp.bfloat16


# ----------------------------------------------------------------------------
# Small helpers
# ----------------------------------------------------------------------------
def _row_block(T, max_block=512):
    """Largest power-of-two row tile (<= max_block) that divides T."""
    for blk in (512, 256, 128, 64, 32, 16, 8):
        if blk <= max_block and T % blk == 0:
            return blk
    return T


def _compiler_params(est_bytes):
    """Grid axis is 'parallel' (both TCs on v7x, harmless on v5e/v6e). Raise the
    scoped VMEM limit above v5e's 16 MiB default based on actual block sizes."""
    limit = int(max(32 * 2 ** 20, min(4 * est_bytes, 96 * 2 ** 20)))
    return pltpu.CompilerParams(dimension_semantics=("parallel",),
                                vmem_limit_bytes=limit)


def _l2_normalize(v):
    """F.normalize(v, p=2, dim=1, eps=1e-12) using EUP rsqrt."""
    ss = jnp.sum(v * v, axis=1, keepdims=True)
    return v * jax.lax.rsqrt(jnp.maximum(ss, 1e-24))   # 1e-24 == eps**2


def _softmax_rows(e):
    """Row softmax with f32 stats; EUP reciprocal for the denominator."""
    m = jnp.max(e, axis=-1, keepdims=True)
    p = jnp.exp(e - m)
    s = jnp.sum(p, axis=-1, keepdims=True)
    # TODO(synk): approx reciprocal -> rows sum to 1 +/- ~1e-3; switch to a true
    # divide if bit-level softmax parity with torch is required downstream.
    return p * pl.reciprocal(s, approx=True)


def _attend(q_all_f32, k_all, v_all, w_out, heads):
    """Per-head attention with lane-dense accumulation into the D-wide output.

    q_all_f32 : [Tq, O] f32 array (all-head query projections, concatenated)
    k_all / v_all : [Tk, O] bf16 (array or Ref)
    w_out : [O, D] bf16 (array or Ref)
    Returns (y [Tq, D] f32, att_last [Tq, Tk] f32 of the LAST head, pre-dropout).
    """
    tq = q_all_f32.shape[0]
    out_size, d_model = w_out.shape
    dh = out_size // heads
    y = jnp.zeros((tq, d_model), jnp.float32)
    att_last = None
    for h in range(heads):                           # heads is small & static
        lo, hi = h * dh, (h + 1) * dh
        q = q_all_f32[:, lo:hi].astype(_BF16)
        # energies = q @ k.T as a bf16 NT matmul with f32 accumulation.
        e = jax.lax.dot_general(q, k_all[:, lo:hi], (((1,), (1,)), ((), ())),
                                preferred_element_type=jnp.float32)
        att = _softmax_rows(e)
        att_last = att
        # TODO(synk): Dropout(p=0.5) on att omitted (eval-mode identity).
        hv = jnp.dot(att.astype(_BF16), v_all[:, lo:hi],
                     preferred_element_type=jnp.float32)
        # Accumulate straight into the lane-dense [Tq, D] output instead of a
        # [Tq, O] head slab (no masked dh-wide column stores, no scratch).
        y = y + jnp.dot(hv.astype(_BF16), w_out[lo:hi, :],
                        preferred_element_type=jnp.float32)
    return y, att_last


# ----------------------------------------------------------------------------
# Kernel 1: hoisted global K/V projection (computed once, bf16 outputs)
# ----------------------------------------------------------------------------
def _kv_project_kernel(x_ref, w_kv_ref, k_ref, v_ref):
    o = k_ref.shape[1]
    kv = jnp.dot(x_ref[...].astype(_BF16), w_kv_ref[...],
                 preferred_element_type=jnp.float32)
    k_ref[...] = kv[:, :o].astype(_BF16)
    v_ref[...] = kv[:, o:].astype(_BF16)


def _project_kv(x, w_kv_bf16, out_size):
    T, D = x.shape
    blk = _row_block(T)
    est = (2 * blk * D * 4 + 2 * D * 2 * out_size * 2
           + 4 * blk * out_size * 2 + blk * 2 * out_size * 4)
    return pl.pallas_call(
        _kv_project_kernel,
        grid=(T // blk,),
        in_specs=[pl.BlockSpec((blk, D), lambda i: (i, 0)),
                  pl.BlockSpec((D, 2 * out_size), lambda i: (0, 0))],
        out_specs=(pl.BlockSpec((blk, out_size), lambda i: (i, 0)),
                   pl.BlockSpec((blk, out_size), lambda i: (i, 0))),
        out_shape=(jax.ShapeDtypeStruct((T, out_size), _BF16),
                   jax.ShapeDtypeStruct((T, out_size), _BF16)),
        compiler_params=_compiler_params(est),
    )(x, w_kv_bf16)


# ----------------------------------------------------------------------------
# Kernel 2: attention over row blocks / segments (+ optional local attn fusion)
# ----------------------------------------------------------------------------
def _make_attn_kernel(global_heads, local_heads, fusion):
    with_local = fusion is not None

    def kernel(x_ref, wq_g_ref, wout_g_ref, k_ref, v_ref, *rest):
        if with_local:
            l_qkv_ref, l_out_ref, y_ref, att_ref = rest
        else:
            y_ref, att_ref = rest

        x_bf = x_ref[...].astype(_BF16)

        # ---- global attention: this block's queries over the full sequence.
        # K/V were hoisted into a preceding pallas_call (computed once, bf16).
        q_all = jnp.dot(x_bf, wq_g_ref[...], preferred_element_type=jnp.float32)
        y_g, att = _attend(q_all, k_ref, v_ref, wout_g_ref, global_heads)
        att_ref[...] = att        # LAST global head, pre-dropout (torch semantics)

        if not with_local:
            y_ref[...] = y_g
            return

        # ---- local attention restricted to this segment.
        o_l = l_out_ref.shape[0]
        qkv_l = jnp.dot(x_bf, l_qkv_ref[...], preferred_element_type=jnp.float32)
        k_l = qkv_l[:, o_l:2 * o_l].astype(_BF16)
        v_l = qkv_l[:, 2 * o_l:].astype(_BF16)
        y_l, _ = _attend(qkv_l[:, :o_l], k_l, v_l, l_out_ref, local_heads)

        # ---- F.normalize(p=2, dim=1) on both, then fuse.
        g_n = _l2_normalize(y_g)
        l_n = _l2_normalize(y_l)
        if fusion == 'add':
            fused = g_n + l_n
        elif fusion == 'mult':
            fused = g_n * l_n
        elif fusion == 'avg':
            fused = (g_n + l_n) * 0.5
        else:                      # 'max'
            fused = jnp.maximum(g_n, l_n)
        y_ref[...] = fused

    return kernel


# ----------------------------------------------------------------------------
# Wrapper
# ----------------------------------------------------------------------------
def multi_attention_forward(x, global_params, local_params=None,
                            num_segments=None, fusion=None):
    """MultiAttention.forward (eval). *_params[s] = (w_qkv [D,3O], w_out [O,D], heads)."""
    T, D = x.shape
    g_qkv, g_out, g_heads = global_params
    o_g = g_out.shape[0]

    # Weights converted to bf16 ONCE here (halves weight DMA / VMEM residency,
    # no per-grid-step casts in the kernels). MXU still accumulates in f32.
    g_qkv_bf = g_qkv.astype(_BF16)
    wq_g = g_qkv_bf[:, :o_g]
    wkv_g = g_qkv_bf[:, o_g:]
    wout_g = g_out.astype(_BF16)

    # Hoisted global K/V projection: computed once, not once per grid step.
    k_all, v_all = _project_kv(x, wkv_g, o_g)

    # Constant-index blocks (weights, K, V) in bf16 bytes.
    # TODO(synk): these could be single-buffered (pipeline_mode=pl.Buffered(1) /
    # whole-array VMEM residency) to further shrink VMEM on v7x's 64 MiB.
    const_bytes = 2 * (D * o_g + o_g * D + 2 * T * o_g) * 2

    if num_segments is None or fusion is None:
        # Global-only path (MultiAttention defaults), row-tiled so VMEM scales
        # with [t_q, T] score tiles instead of the full [T, T] attention matrix.
        t_q = _row_block(T)
        est = (2 * t_q * D * 4 + const_bytes
               + 2 * (t_q * D * 4 + t_q * T * 4) + 6 * t_q * T * 4)
        return pl.pallas_call(
            _make_attn_kernel(g_heads, 0, None),
            grid=(T // t_q,),
            in_specs=[
                pl.BlockSpec((t_q, D), lambda i: (i, 0)),     # this block's query rows
                pl.BlockSpec((D, o_g), lambda i: (0, 0)),     # global Q weights (bf16)
                pl.BlockSpec((o_g, D), lambda i: (0, 0)),     # global out-proj (bf16)
                pl.BlockSpec((T, o_g), lambda i: (0, 0)),     # hoisted K (bf16)
                pl.BlockSpec((T, o_g), lambda i: (0, 0)),     # hoisted V (bf16)
            ],
            out_specs=(pl.BlockSpec((t_q, D), lambda i: (i, 0)),
                       pl.BlockSpec((t_q, T), lambda i: (i, 0))),
            out_shape=(jax.ShapeDtypeStruct((T, D), jnp.float32),
                       jax.ShapeDtypeStruct((T, T), jnp.float32)),
            compiler_params=_compiler_params(est),
        )(x, wq_g, wout_g, k_all, v_all)

    assert fusion in ('add', 'mult', 'avg', 'max')
    n_seg = num_segments
    # TODO(synk): ragged last segment (T % num_segments != 0) not handled; the
    # torch module allows it via ceil-sized segments -- pad T if needed.
    assert T % n_seg == 0, "T must be divisible by num_segments"
    t_seg = T // n_seg

    l_heads = local_params[0][2]
    assert all(p[2] == l_heads for p in local_params)
    l_qkv = jnp.stack([p[0] for p in local_params]).astype(_BF16)   # [S, D, 3*O_l]
    l_out = jnp.stack([p[1] for p in local_params]).astype(_BF16)   # [S, O_l, D]
    o_l = l_out.shape[1]

    est = (2 * t_seg * D * 4 + const_bytes
           + 2 * (D * 3 * o_l + o_l * D) * 2
           + 2 * (t_seg * D * 4 + t_seg * T * 4) + 8 * t_seg * T * 4)
    y, att = pl.pallas_call(
        _make_attn_kernel(g_heads, l_heads, fusion),
        grid=(n_seg,),                                   # one grid step per segment
        in_specs=[
            pl.BlockSpec((t_seg, D), lambda s: (s, 0)),            # this segment's rows
            pl.BlockSpec((D, o_g), lambda s: (0, 0)),              # global Q weights (bf16)
            pl.BlockSpec((o_g, D), lambda s: (0, 0)),              # global out-proj (bf16)
            pl.BlockSpec((T, o_g), lambda s: (0, 0)),              # hoisted K (bf16)
            pl.BlockSpec((T, o_g), lambda s: (0, 0)),              # hoisted V (bf16)
            pl.BlockSpec((None, D, 3 * o_l), lambda s: (s, 0, 0)),  # this segment's local QKV
            pl.BlockSpec((None, o_l, D), lambda s: (s, 0, 0)),      # local out-proj
        ],
        out_specs=(pl.BlockSpec((t_seg, D), lambda s: (s, 0)),     # fused weighted rows
                   pl.BlockSpec((t_seg, T), lambda s: (s, 0))),    # global att rows (last head)
        out_shape=(jax.ShapeDtypeStruct((T, D), jnp.float32),
                   jax.ShapeDtypeStruct((T, T), jnp.float32)),
        compiler_params=_compiler_params(est),
    )(x, wq_g, wout_g, k_all, v_all, l_qkv, l_out)
    return y, att


# ----------------------------------------------------------------------------
# Parameter construction (deterministic synthetic weights)
# ----------------------------------------------------------------------------
def init_self_attention_params(key, input_size, output_size, heads):
    """Fused [D, 3*output_size] QKV weights and [output_size, D] out-projection,
    equivalent to `heads` independent bias-free Linears for Q, K, V plus `out`,
    already transposed for x @ W on the MXU."""
    dh = output_size // heads
    kq, kk, kv, ko = jax.random.split(key, 4)
    # Keep energies O(1) so the synthetic test is numerically well-conditioned.
    scale_in = 1.0 / (input_size ** 0.75)
    scale_out = 1.0 / math.sqrt(output_size)

    def head_block(k):
        w = jax.random.normal(k, (heads, input_size, dh), jnp.float32) * scale_in
        return w.transpose(1, 0, 2).reshape(input_size, heads * dh)

    w_qkv = jnp.concatenate([head_block(kq), head_block(kk), head_block(kv)],
                            axis=1)                                 # [D, 3*O]
    w_out = jax.random.normal(ko, (output_size, input_size), jnp.float32) * scale_out
    return w_qkv, w_out, heads


# ----------------------------------------------------------------------------
# Pure-JAX reference (mirrors the torch forward exactly, all f32)
# ----------------------------------------------------------------------------
def _self_attention_ref(x, w_qkv, w_out, heads):
    out_size = w_out.shape[0]
    dh = out_size // heads
    q_all = x @ w_qkv[:, :out_size]
    k_all = x @ w_qkv[:, out_size:2 * out_size]
    v_all = x @ w_qkv[:, 2 * out_size:]
    outs, att = [], None
    for h in range(heads):
        sl = slice(h * dh, (h + 1) * dh)
        e = q_all[:, sl] @ k_all[:, sl].T
        att = jax.nn.softmax(e, axis=-1)
        outs.append(att @ v_all[:, sl])
    return jnp.concatenate(outs, axis=-1) @ w_out, att


def _multi_attention_ref(x, gp, lp, num_segments, fusion):
    y, att = _self_attention_ref(x, *gp)
    if num_segments is None or fusion is None:
        return y, att
    T = x.shape[0]
    seg = math.ceil(T / num_segments)
    eps = 1e-12
    pieces = []
    for s in range(num_segments):
        lo, hi = s * seg, min((s + 1) * seg, T)
        yl, _ = _self_attention_ref(x[lo:hi], *lp[s])
        g = y[lo:hi]
        gn = g / jnp.maximum(jnp.linalg.norm(g, axis=1, keepdims=True), eps)
        ln = yl / jnp.maximum(jnp.linalg.norm(yl, axis=1, keepdims=True), eps)
        if fusion == 'add':
            pieces.append(gn + ln)
        elif fusion == 'mult':
            pieces.append(gn * ln)
        elif fusion == 'avg':
            pieces.append((gn + ln) / 2)
        elif fusion == 'max':
            pieces.append(jnp.maximum(gn, ln))
    return jnp.concatenate(pieces, axis=0), att


# ----------------------------------------------------------------------------
if __name__ == "__main__":
    # Small, lane-dense config (last dims multiples of 128 -> unmasked stores).
    T = 128               # frames
    INPUT_SIZE = 128      # feature size D
    OUTPUT_SIZE = 128     # attention hidden size
    GLOBAL_HEADS = 2      # global head dim = 64
    NUM_SEGMENTS = 2      # must be >= 2
    FUSION = 'add'
    LOCAL_HEADS = 4       # fixed in the torch module; local head dim = 16
    LOCAL_OUTPUT = OUTPUT_SIZE // NUM_SEGMENTS

    key = jax.random.PRNGKey(0)
    kx, kg, *kl = jax.random.split(key, 2 + NUM_SEGMENTS)

    x = jax.random.normal(kx, (T, INPUT_SIZE), jnp.float32)
    global_params = init_self_attention_params(kg, INPUT_SIZE, OUTPUT_SIZE, GLOBAL_HEADS)
    local_params = [
        init_self_attention_params(kl[s], INPUT_SIZE, LOCAL_OUTPUT, LOCAL_HEADS)
        for s in range(NUM_SEGMENTS)
    ]

    # --- fused path (global + local attentions + normalize/add fusion) ---
    weighted_value, attn_weights = multi_attention_forward(
        x, global_params, local_params, NUM_SEGMENTS, FUSION)
    weighted_value = jax.block_until_ready(weighted_value)
    attn_weights = jax.block_until_ready(attn_weights)
    assert weighted_value.shape == (T, INPUT_SIZE)
    assert attn_weights.shape == (T, T)

    ref_wv, ref_att = _multi_attention_ref(
        x, global_params, local_params, NUM_SEGMENTS, FUSION)
    assert jnp.allclose(weighted_value, ref_wv, atol=3e-2, rtol=3e-2), \
        float(jnp.max(jnp.abs(weighted_value - ref_wv)))
    assert jnp.allclose(attn_weights, ref_att, atol=2e-2, rtol=2e-2), \
        float(jnp.max(jnp.abs(attn_weights - ref_att)))

    # --- global-only path (num_segments=None / fusion=None module defaults) ---
    y_g, att_g = multi_attention_forward(x, global_params)
    y_g = jax.block_until_ready(y_g)
    ref_yg, ref_attg = _multi_attention_ref(x, global_params, None, None, None)
    assert jnp.allclose(y_g, ref_yg, atol=3e-2, rtol=3e-2), \
        float(jnp.max(jnp.abs(y_g - ref_yg)))
    assert jnp.allclose(att_g, ref_attg, atol=2e-2, rtol=2e-2)

    print("KERNEL_OK")
</pallas_src>

<mosaic_0001>
module attributes {stable_mosaic.version = 11 : i64} {
  func.func @_kv_project_kernel(%arg0: i32, %arg1: memref<128x128xf32, #tpu.memory_space<vmem>>, %arg2: memref<128x256xbf16, #tpu.memory_space<vmem>>, %arg3: memref<128x128xbf16, #tpu.memory_space<vmem>>, %arg4: memref<128x128xbf16, #tpu.memory_space<vmem>>) attributes {dimension_semantics = [#tpu.dimension_semantics<parallel>], iteration_bounds = array<i64: 1>, scalar_prefetch = 0 : i64, scratch_operands = 0 : i64, tpu.core_type = #tpu.core_type<tc>, window_params = [{transform_indices = @transform_0, window_bounds = array<i64: 128, 128>}, {pipeline_mode = #tpu.pipeline_mode<synchronous>, transform_indices = @transform_1, window_bounds = array<i64: 128, 256>}, {transform_indices = @transform_2, window_bounds = array<i64: 128, 128>}, {transform_indices = @transform_3, window_bounds = array<i64: 128, 128>}]} {
    %c0 = arith.constant 0 : index
    %c0_0 = arith.constant 0 : index
    %0 = vector.load %arg1[%c0, %c0_0] : memref<128x128xf32, #tpu.memory_space<vmem>>, vector<128x128xf32>
    %1 = arith.truncf %0 : vector<128x128xf32> to vector<128x128xbf16>
    %c0_1 = arith.constant 0 : index
    %c0_2 = arith.constant 0 : index
    %2 = vector.load %arg2[%c0_1, %c0_2] : memref<128x256xbf16, #tpu.memory_space<vmem>>, vector<128x256xbf16>
    %cst = arith.constant dense<0.000000e+00> : vector<128x256xf32>
    %3 = tpu.matmul %1, %2, %cst {dimension_numbers = #tpu.dot_dimension_numbers<[1], [0], [0], [1], [0, 0, 1, 1], [], []>} : vector<128x128xbf16>, vector<128x256xbf16>, vector<128x256xf32> -> vector<128x256xf32>
    %4 = vector.extract_strided_slice %3 {offsets = [0, 0], sizes = [128, 128], strides = [1, 1]} : vector<128x256xf32> to vector<128x128xf32>
    %5 = arith.truncf %4 : vector<128x128xf32> to vector<128x128xbf16>
    %c0_3 = arith.constant 0 : index
    %c0_4 = arith.constant 0 : index
    %6 = vector.load %arg3[%c0_3, %c0_4] : memref<128x128xbf16, #tpu.memory_space<vmem>>, vector<128x128xbf16>
    tpu.vector_store %arg3[%c0_3, %c0_4], %5 {strides = array<i32>} : memref<128x128xbf16, #tpu.memory_space<vmem>>, vector<128x128xbf16>,
    %7 = vector.extract_strided_slice %3 {offsets = [0, 128], sizes = [128, 128], strides = [1, 1]} : vector<128x256xf32> to vector<128x128xf32>
    %8 = arith.truncf %7 : vector<128x128xf32> to vector<128x128xbf16>
    %c0_5 = arith.constant 0 : index
    %c0_6 = arith.constant 0 : index
    %9 = vector.load %arg4[%c0_5, %c0_6] : memref<128x128xbf16, #tpu.memory_space<vmem>>, vector<128x128xbf16>
    tpu.vector_store %arg4[%c0_5, %c0_6], %8 {strides = array<i32>} : memref<128x128xbf16, #tpu.memory_space<vmem>>, vector<128x128xbf16>,
    return
  }
  func.func @transform_0(%arg0: i32) -> (i32, i32) {
    %c0_i32 = arith.constant 0 : i32
    %c0_i32_0 = arith.constant 0 : i32
    return %arg0, %c0_i32 : i32, i32
  }
  func.func @transform_1(%arg0: i32) -> (i32, i32) {
    %c0_i32 = arith.constant 0 : i32
    %c0_i32_0 = arith.constant 0 : i32
    %c0_i32_1 = arith.constant 0 : i32
    return %c0_i32, %c0_i32_0 : i32, i32
  }
  func.func @transform_2(%arg0: i32) -> (i32, i32) {
    %c0_i32 = arith.constant 0 : i32
    %c0_i32_0 = arith.constant 0 : i32
    return %arg0, %c0_i32 : i32, i32
  }
  func.func @transform_3(%arg0: i32) -> (i32, i32) {
    %c0_i32 = arith.constant 0 : i32
    %c0_i32_0 = arith.constant 0 : i32
    return %arg0, %c0_i32 : i32, i32
  }
}

</mosaic_0001>

<bundles_post_ra>
// kernel: tpu_custom_call.1
= control target key start
LH: loop header
LB: loop body
LE: loop exit
PB: predicated region body
PF: predicated region fallthrough
CT: control target
= control target key end

     0   :  { %9 = vsyncpa [#allocation3], 0  ;;  %s709_s0 = inlined_call_operand.hbm [shape: f32[128,128], index: 0, kind: input, shape index: {}]   ;;  %s710_s1 = inlined_call_operand.hbm [shape: bf16[128,256], index: 1, kind: input, shape index: {}]   ;;  %s711_s2 = inlined_call_operand.hbm [shape: bf16[128,128], index: 2, kind: output, shape index: {0}]   ;;  %s712_s3 = inlined_call_operand.hbm [shape: bf16[128,128], index: 3, kind: output, shape index: {1}]  }
   0x1   :  { %10 = vsyncpa [#allocation6], 0 }
   0x2   :  { %11 = vsyncpa [#allocation4], 0 }
   0x3   :  { %12 = vsyncpa [#allocation9], 0  ;;  %s17_s14 = sshll.u32 %s709_s0, 4  ;;  %s669_s15 = smov [#allocation2]   ;;  %s18_s14 = int_to_ptr.hbm [resolvable:$true] %s17_s14 }
   0x4   :  { %s19_s16 = sshll.u32 %s669_s15, 4  ;;  %s30_s19 = sshll.u32 %s710_s1, 4  ;;  %s20_s16 = int_to_ptr.vmem [resolvable:$true] %s19_s16  ;;  %s31_s19 = int_to_ptr.hbm [resolvable:$true] %s30_s19 }
   0x5   :  { %s670_s20 = smov 128   ;;  %s671_s21 = smov 8  }
   0x6   :  { %25 = dma.hbm_to_vmem [thread:$0]  %s18_s14, 2048, %s20_s16, [#allocation3], %s670_s20, %s670_s20, %s671_s21  }
   0x7   :  { %s672_s22 = smov [#allocation5]  }
   0x8   :  { %s32_s23 = sshll.u32 %s672_s22, 4  ;;  %s33_s23 = int_to_ptr.vmem [resolvable:$true] %s32_s23 }
   0x9   :  { %38 = dma.hbm_to_vmem [thread:$0]  %s31_s19, 2048, %s33_s23, [#allocation6], %s670_s20, %s670_s20, %s671_s21  }
   0xa   :  { %661 = dma.done.wait [#allocation3], 2048  }
   0xb   :  { %662 = vsyncadd [#allocation3], 4294965248 }
   0xc   :  { %663 = dma.done.wait [#allocation6], 2048  }
   0xd   :  { %664 = vsyncadd [#allocation6], 4294965248  ;;  %v425_v0 = vld [vmem:[#allocation5 + $0x70] sm:$0xf]  ;;  %v446_v1 = vld [vmem:[#allocation5 + $0x74] sm:$0xf0] }
   0xe   :  { %v445_v2 = vld [vmem:[#allocation5 + $0x74] sm:$0xf]  ;;  %v426_v3 = vor.u32 %v446_v1, %v425_v0  ;;  %v427_v4 = vld [vmem:[#allocation5 + $0x78] sm:$0xf0]  ;;  %v417_v5 = vld [vmem:[#allocation5 + $0x60] sm:$0xf] }
   0xf   :  { %v444_v6 = vld [vmem:[#allocation5 + $0x64] sm:$0xf0]  ;;  %v430_v7 = vor.u32 %v445_v2, %v427_v4  ;;  %v443_v8 = vld [vmem:[#allocation5 + $0x64] sm:$0xf]  ;;  %v419_v9 = vld [vmem:[#allocation5 + $0x68] sm:$0xf0] }
  0x10   :  { %167 = vmatpush.bf16.msra.mxu0 %v426_v3  ;;  %541 = vmatpush.bf16.msra.mxu2 %v426_v3  ;;  %v418_v10 = vor.u32 %v444_v6, %v417_v5  ;;  %v422_v11 = vor.u32 %v443_v8, %v419_v9  ;;  %v409_v12 = vld [vmem:[#allocation5 + $0x50] sm:$0xf]  ;;  %v442_v13 = vld [vmem:[#allocation5 + $0x54] sm:$0xf0]  ;;  %v441_v14 = vld [vmem:[#allocation5 + $0x54] sm:$0xf] }
  0x11   :  { %216 = vmatpush.bf16.msra.mxu1 %v430_v7  ;;  %549 = vmatpush.bf16.msra.mxu3 %v430_v7  ;;  %v411_v15 = vld [vmem:[#allocation5 + $0x58] sm:$0xf0]  ;;  %v410_v16 = vor.u32 %v442_v13, %v409_v12  ;;  %v401_v18 = vld [vmem:[#allocation5 + $0x40] sm:$0xf]  ;;  %v440_v19 = vld [vmem:[#allocation5 + $0x44] sm:$0xf0] }
  0x12   :  { %v414_v17 = vor.u32 %v441_v14, %v411_v15  ;;  %v439_v20 = vld [vmem:[#allocation5 + $0x44] sm:$0xf]  ;;  %v403_v21 = vld [vmem:[#allocation5 + $0x48] sm:$0xf0]  ;;  %v402_v22 = vor.u32 %v440_v19, %v401_v18  ;;  %v393_v24 = vld [vmem:[#allocation5 + $0x30] sm:$0xf] }
  0x13   :  { %v406_v23 = vor.u32 %v439_v20, %v403_v21  ;;  %v438_v25 = vld [vmem:[#allocation5 + $0x34] sm:$0xf0]  ;;  %v437_v26 = vld [vmem:[#allocation5 + $0x34] sm:$0xf]  ;;  %v395_v27 = vld [vmem:[#allocation5 + $0x38] sm:$0xf0] }
  0x14   :  { %168 = vmatpush.bf16.msra.mxu0 %v418_v10  ;;  %542 = vmatpush.bf16.msra.mxu2 %v418_v10  ;;  %v394_v28 = vor.u32 %v438_v25, %v393_v24  ;;  %v398_v29 = vor.u32 %v437_v26, %v395_v27  ;;  %v385_v30 = vld [vmem:[#allocation5 + $0x20] sm:$0xf]  ;;  %v436_v31 = vld [vmem:[#allocation5 + $0x24] sm:$0xf0]  ;;  %v435_v32 = vld [vmem:[#allocation5 + $0x24] sm:$0xf] }
  0x15   :  { %217 = vmatpush.bf16.msra.mxu1 %v422_v11  ;;  %550 = vmatpush.bf16.msra.mxu3 %v422_v11  ;;  %v387_v33 = vld [vmem:[#allocation5 + $0x28] sm:$0xf0]  ;;  %v386_v34 = vor.u32 %v436_v31, %v385_v30  ;;  %v377_v36 = vld [vmem:[#allocation5 + $0x10] sm:$0xf]  ;;  %v434_v37 = vld [vmem:[#allocation5 + $0x14] sm:$0xf0] }
  0x16   :  { %v390_v35 = vor.u32 %v435_v32, %v387_v33  ;;  %v433_v38 = vld [vmem:[#allocation5 + $0x14] sm:$0xf]  ;;  %v379_v39 = vld [vmem:[#allocation5 + $0x18] sm:$0xf0]  ;;  %v378_v40 = vor.u32 %v434_v37, %v377_v36  ;;  %v369_v42 = vld [vmem:[#allocation5] sm:$0xf] }
  0x17   :  { %v382_v41 = vor.u32 %v433_v38, %v379_v39  ;;  %v432_v43 = vld [vmem:[#allocation5 + $0x4] sm:$0xf0]  ;;  %v431_v44 = vld [vmem:[#allocation5 + $0x4] sm:$0xf]  ;;  %v371_v45 = vld [vmem:[#allocation5 + $0x8] sm:$0xf0] }
  0x18   :  { %169 = vmatpush.bf16.msra.mxu0 %v410_v16  ;;  %543 = vmatpush.bf16.msra.mxu2 %v410_v16  ;;  %v47_v46 = vld [vmem:[#allocation2] sm:$0xff]  ;;  %v370_v47 = vor.u32 %v432_v43, %v369_v42  ;;  %v48_v48 = vld [vmem:[#allocation2 + $0x8] sm:$0xff]  ;;  %v374_v51 = vor.u32 %v431_v44, %v371_v45  ;;  %v49_v54 = vld [vmem:[#allocation2 + $0x10] sm:$0xff]  ;;  %s673_s0 = smov [#allocation7]   ;;  %s335_s26 = sshll.u32 %s711_s2, 4  ;;  %s336_s26 = int_to_ptr.hbm [resolvable:$true] %s335_s26 }
  0x19   :  { %218 = vmatpush.bf16.msra.mxu1 %v414_v17  ;;  %551 = vmatpush.bf16.msra.mxu3 %v414_v17  ;;  %v55_v49 = vld [vmem:[#allocation2 + $0x40] sm:$0xff]  ;;  %v56_v50 = vld [vmem:[#allocation2 + $0x48] sm:$0xff]  ;;  %v63_v52 = vpack.c.bf16 %v48_v48, %v47_v46  ;;  %v50_v55 = vld [vmem:[#allocation2 + $0x18] sm:$0xff]  ;;  %s333_s1 = sshll.u32 %s673_s0, 4  ;;  %s674_s27 = smov [#allocation8]   ;;  %s334_s1 = int_to_ptr.vmem [resolvable:$true] %s333_s1 }
  0x1a   :  { %v67_v53 = vpack.c.bf16 %v56_v50, %v55_v49  ;;  %v57_v56 = vld [vmem:[#allocation2 + $0x50] sm:$0xff]  ;;  %v58_v57 = vld [vmem:[#allocation2 + $0x58] sm:$0xff]  ;;  %v64_v58 = vpack.c.bf16 %v50_v55, %v49_v54  ;;  %v51_v60 = vld [vmem:[#allocation2 + $0x20] sm:$0xff]  ;;  %s346_s28 = sshll.u32 %s674_s27, 4  ;;  %s348_s4 = sshll.u32 %s712_s3, 4  ;;  %s347_s28 = int_to_ptr.vmem [resolvable:$true] %s346_s28  ;;  %s349_s4 = int_to_ptr.hbm [resolvable:$true] %s348_s4 }
  0x1b   :  { %v68_v59 = vpack.c.bf16 %v58_v57, %v57_v56  ;;  %v52_v61 = vld [vmem:[#allocation2 + $0x28] sm:$0xff]  ;;  %v59_v62 = vld [vmem:[#allocation2 + $0x60] sm:$0xff]  ;;  %v53_v2 = vld [vmem:[#allocation2 + $0x30] sm:$0xff]  ;;  %s675_s5 = smov 64   ;;  %s676_s6 = smov 4  }
  0x1c   :  { %170 = vmatpush.bf16.msra.mxu0 %v402_v22  ;;  %544 = vmatpush.bf16.msra.mxu2 %v402_v22  ;;  %v60_v63 = vld [vmem:[#allocation2 + $0x68] sm:$0xff]  ;;  %v65_v0 = vpack.c.bf16 %v52_v61, %v51_v60  ;;  %v54_v3 = vld [vmem:[#allocation2 + $0x38] sm:$0xff]  ;;  %v61_v4 = vld [vmem:[#allocation2 + $0x70] sm:$0xff] }
  0x1d   :  { %219 = vmatpush.bf16.msra.mxu1 %v406_v23  ;;  %552 = vmatpush.bf16.msra.mxu3 %v406_v23  ;;  %v69_v1 = vpack.c.bf16 %v60_v63, %v59_v62  ;;  %v62_v5 = vld [vmem:[#allocation2 + $0x78] sm:$0xff]  ;;  %v66_v6 = vpack.c.bf16 %v54_v3, %v53_v2 }
  0x1e   :  { %v70_v7 = vpack.c.bf16 %v62_v5, %v61_v4 }
  0x20   :  { %171 = vmatpush.bf16.msra.mxu0 %v394_v28  ;;  %545 = vmatpush.bf16.msra.mxu2 %v394_v28 }
  0x21   :  { %220 = vmatpush.bf16.msra.mxu1 %v398_v29  ;;  %553 = vmatpush.bf16.msra.mxu3 %v398_v29 }
  0x24   :  { %172 = vmatpush.bf16.msra.mxu0 %v386_v34  ;;  %546 = vmatpush.bf16.msra.mxu2 %v386_v34 }
  0x25   :  { %221 = vmatpush.bf16.msra.mxu1 %v390_v35  ;;  %554 = vmatpush.bf16.msra.mxu3 %v390_v35 }
  0x28   :  { %173 = vmatpush.bf16.msra.mxu0 %v378_v40  ;;  %547 = vmatpush.bf16.msra.mxu2 %v378_v40 }
  0x29   :  { %222 = vmatpush.bf16.msra.mxu1 %v382_v41  ;;  %555 = vmatpush.bf16.msra.mxu3 %v382_v41 }
  0x2c   :  { %174 = vmatpush.bf16.msra.mxu0 %v370_v47  ;;  %548 = vmatpush.bf16.msra.mxu2 %v370_v47 }
  0x2d   :  { %223 = vmatpush.bf16.msra.mxu1 %v374_v51  ;;  %556 = vmatpush.bf16.msra.mxu3 %v374_v51 }
  0x2f   :  { %175 = vmatmul.bf16.vlgmr.msra.gmra.mxu0 %v63_v52  ;;  %195 = vmatmul.bf16.vlgmr.msra.gmra.mxu2 %v67_v53 }
  0x30   :  { %224 = vmatmul.bf16.vlgmr.msra.gmra.mxu1 %v63_v52  ;;  %244 = vmatmul.bf16.vlgmr.msra.gmra.mxu3 %v67_v53 }
  0x3f   :  { %180 = vmatmul.bf16.gmra.mxu0 %v64_v58  ;;  %200 = vmatmul.bf16.gmra.mxu2 %v68_v59 }
  0x40   :  { %229 = vmatmul.bf16.gmra.mxu1 %v64_v58  ;;  %249 = vmatmul.bf16.gmra.mxu3 %v68_v59 }
  0x4f   :  { %185 = vmatmul.bf16.gmra.mxu0 %v65_v0  ;;  %205 = vmatmul.bf16.gmra.mxu2 %v69_v1 }
  0x50   :  { %234 = vmatmul.bf16.gmra.mxu1 %v65_v0  ;;  %254 = vmatmul.bf16.gmra.mxu3 %v69_v1 }
  0x5f   :  { %190 = vmatmul.bf16.gmra.mxu0 %v66_v6  ;;  %210 = vmatmul.bf16.gmra.mxu2 %v70_v7 }
  0x60   :  { %239 = vmatmul.bf16.gmra.mxu1 %v66_v6  ;;  %259 = vmatmul.bf16.gmra.mxu3 %v70_v7 }
  0xac   :  { %v176_v8 = vpop.f32.mrf.mxu0 }
  0xad   :  { %v225_v9 = vpop.f32.mrf.mxu1 }
  0xb2   :  { %v196_v10 = vpop.f32.mrf.mxu2 }
  0xb3   :  { %v245_v11 = vpop.f32.mrf.mxu3 }
  0xb4   :  { %v178_v12 = vpop.f32.mrf.mxu0 }
  0xb5   :  { %v450_v13 = vpack.c.bf16 %v178_v12, %v176_v8  ;;  %v227_v14 = vpop.f32.mrf.mxu1 }
  0xb6   :  { %v490_v15 = vpack.c.bf16 %v227_v14, %v225_v9 }
  0xb7   :  { %451 = vst [vmem:[#allocation7] sm:$0xff] %v450_v13  }
  0xb8   :  { %491 = vst [vmem:[#allocation8] sm:$0xff] %v490_v15  }
  0xba   :  { %v198_v16 = vpop.f32.mrf.mxu2 }
  0xbb   :  { %v470_v17 = vpack.c.bf16 %v198_v16, %v196_v10  ;;  %v247_v18 = vpop.f32.mrf.mxu3 }
  0xbc   :  { %v510_v19 = vpack.c.bf16 %v247_v18, %v245_v11  ;;  %v181_v20 = vpop.f32.mrf.mxu0 }
  0xbd   :  { %530 = vst [vmem:[#allocation7 + $0x20] sm:$0xff] %v470_v17   ;;  %v230_v21 = vpop.f32.mrf.mxu1 }
  0xbe   :  { %537 = vst [vmem:[#allocation8 + $0x20] sm:$0xff] %v510_v19  }
  0xc2   :  { %v201_v22 = vpop.f32.mrf.mxu2 }
  0xc3   :  { %v250_v23 = vpop.f32.mrf.mxu3 }
  0xc4   :  { %v183_v24 = vpop.f32.mrf.mxu0 }
  0xc5   :  { %v455_v25 = vpack.c.bf16 %v183_v24, %v181_v20  ;;  %v232_v26 = vpop.f32.mrf.mxu1 }
  0xc6   :  { %v495_v27 = vpack.c.bf16 %v232_v26, %v230_v21 }
  0xc7   :  { %527 = vst [vmem:[#allocation7 + $0x8] sm:$0xff] %v455_v25  }
  0xc8   :  { %534 = vst [vmem:[#allocation8 + $0x8] sm:$0xff] %v495_v27  }
  0xca   :  { %v203_v28 = vpop.f32.mrf.mxu2 }
  0xcb   :  { %v475_v29 = vpack.c.bf16 %v203_v28, %v201_v22  ;;  %v252_v30 = vpop.f32.mrf.mxu3 }
  0xcc   :  { %v515_v31 = vpack.c.bf16 %v252_v30, %v250_v23  ;;  %v186_v32 = vpop.f32.mrf.mxu0 }
  0xcd   :  { %531 = vst [vmem:[#allocation7 + $0x28] sm:$0xff] %v475_v29   ;;  %v235_v33 = vpop.f32.mrf.mxu1 }
  0xce   :  { %538 = vst [vmem:[#allocation8 + $0x28] sm:$0xff] %v515_v31  }
  0xd2   :  { %v206_v34 = vpop.f32.mrf.mxu2 }
  0xd3   :  { %v255_v35 = vpop.f32.mrf.mxu3 }
  0xd4   :  { %v188_v36 = vpop.f32.mrf.mxu0 }
  0xd5   :  { %v460_v37 = vpack.c.bf16 %v188_v36, %v186_v32  ;;  %v237_v38 = vpop.f32.mrf.mxu1 }
  0xd6   :  { %v500_v39 = vpack.c.bf16 %v237_v38, %v235_v33 }
  0xd7   :  { %528 = vst [vmem:[#allocation7 + $0x10] sm:$0xff] %v460_v37  }
  0xd8   :  { %535 = vst [vmem:[#allocation8 + $0x10] sm:$0xff] %v500_v39  }
  0xda   :  { %v208_v40 = vpop.f32.mrf.mxu2 }
  0xdb   :  { %v480_v41 = vpack.c.bf16 %v208_v40, %v206_v34  ;;  %v257_v42 = vpop.f32.mrf.mxu3 }
  0xdc   :  { %v520_v43 = vpack.c.bf16 %v257_v42, %v255_v35  ;;  %v191_v44 = vpop.f32.mrf.mxu0 }
  0xdd   :  { %532 = vst [vmem:[#allocation7 + $0x30] sm:$0xff] %v480_v41   ;;  %v240_v45 = vpop.f32.mrf.mxu1 }
  0xde   :  { %539 = vst [vmem:[#allocation8 + $0x30] sm:$0xff] %v520_v43  }
  0xe2   :  { %v211_v46 = vpop.f32.mrf.mxu2 }
  0xe3   :  { %v260_v47 = vpop.f32.mrf.mxu3 }
  0xe4   :  { %v193_v48 = vpop.f32.mrf.mxu0 }
  0xe5   :  { %v465_v49 = vpack.c.bf16 %v193_v48, %v191_v44  ;;  %v242_v50 = vpop.f32.mrf.mxu1 }
  0xe6   :  { %v505_v51 = vpack.c.bf16 %v242_v50, %v240_v45 }
  0xe7   :  { %529 = vst [vmem:[#allocation7 + $0x18] sm:$0xff] %v465_v49  }
  0xe8   :  { %536 = vst [vmem:[#allocation8 + $0x18] sm:$0xff] %v505_v51  }
  0xea   :  { %v213_v52 = vpop.f32.mrf.mxu2 }
  0xeb   :  { %v485_v53 = vpack.c.bf16 %v213_v52, %v211_v46  ;;  %v262_v54 = vpop.f32.mrf.mxu3 }
  0xec   :  { %v525_v55 = vpack.c.bf16 %v262_v54, %v260_v47 }
  0xed   :  { %533 = vst [vmem:[#allocation7 + $0x38] sm:$0xff] %v485_v53  }
  0xee   :  { %540 = vst [vmem:[#allocation8 + $0x38] sm:$0xff] %v525_v55   ;;  %341 = dma.vmem_to_hbm [thread:$0]  %s334_s1, 1024, %s336_s26, [#allocation4], %s675_s5, %s675_s5, %s676_s6  }
  0xef   :  { %354 = dma.vmem_to_hbm [thread:$0]  %s347_s28, 1024, %s349_s4, [#allocation9], %s675_s5, %s675_s5, %s676_s6  }
  0xf0   :  { %665 = dma.done.wait [#allocation4], 1024  }
  0xf1   :  { %666 = vsyncadd [#allocation4], 4294966272 }
  0xf2   :  { %667 = dma.done.wait [#allocation9], 1024  }
  0xf3   :  { %668 = vsyncadd [#allocation9], 4294966272 }
  0xf4   :  { %363 = vsyncpa [#allocation3], 1 }
  0xf5   :  { %364 = vsyncpa [#allocation6], 1 }
  0xf6   :  { %365 = vsyncpa [#allocation4], 1 }
  0xf7   :  { %366 = vsyncpa [#allocation9], 1 }

</bundles_post_ra>
